<compile_context>
chip_gen: v7x
topology: tpu7x:2x2x1
jax: 0.10.0
libtpu: 0.0.40
codegen_flags: <defaults>
</compile_context>

<pallas_src>
import jax
import jax.numpy as jnp
from jax.experimental import pallas as pl
from jax.experimental.pallas import tpu as pltpu


IN_DIM = 64
HIDDEN_DIM = 64
NUM_LAYERS = 3
OUT_DIM = 2
OUT_PAD = 128            # lane-dense padded output width
DEFAULT_TILE_M = 1024    # rows per grid step (sweep 512..2048)


def _round_up(x, m):
    return (x + m - 1) // m * m


def renderer_kernel(x_ref, w0_ref, b0_ref, w1_ref, b1_ref, w2_ref, b2_ref,
                    w3_ref, b3_ref, o_ref):
    """Whole MLP for one tile of rows, kept resident in VMEM/vregs."""
    h = x_ref[...]
    h = jnp.maximum(
        jnp.dot(h, w0_ref[...], preferred_element_type=jnp.float32) + b0_ref[...], 0.0)
    h = jnp.maximum(
        jnp.dot(h, w1_ref[...], preferred_element_type=jnp.float32) + b1_ref[...], 0.0)
    h = jnp.maximum(
        jnp.dot(h, w2_ref[...], preferred_element_type=jnp.float32) + b2_ref[...], 0.0)
    out = jnp.dot(h, w3_ref[...], preferred_element_type=jnp.float32) + b3_ref[...]
    o_ref[...] = jnp.clip(out, 0.0, 1.0).astype(o_ref.dtype)


def _weight_spec(shape, single_buffered):
    # Grid-invariant operand: constant index_map (never re-fetched); optionally
    # single-buffered to skip the pointless second pipeline buffer.
    if single_buffered:
        return pl.BlockSpec(shape, lambda i: (0, 0), pipeline_mode=pl.Buffered(1))
    return pl.BlockSpec(shape, lambda i: (0, 0))


def _build_call(n_rows, tile_m, single_buffer_weights):
    in_specs = [pl.BlockSpec((tile_m, IN_DIM), lambda i: (i, 0))]   # x tile
    for shape in [(IN_DIM, HIDDEN_DIM), (1, HIDDEN_DIM),
                  (HIDDEN_DIM, HIDDEN_DIM), (1, HIDDEN_DIM),
                  (HIDDEN_DIM, HIDDEN_DIM), (1, HIDDEN_DIM),
                  (HIDDEN_DIM, OUT_PAD), (1, OUT_PAD)]:
        in_specs.append(_weight_spec(shape, single_buffer_weights))
    return pl.pallas_call(
        renderer_kernel,
        out_shape=jax.ShapeDtypeStruct((n_rows, OUT_PAD), jnp.float32),
        grid_spec=pltpu.PrefetchScalarGridSpec(
            num_scalar_prefetch=0,
            grid=(n_rows // tile_m,),
            in_specs=in_specs,
            out_specs=pl.BlockSpec((tile_m, OUT_PAD), lambda i: (i, 0)),
        ),
        compiler_params=pltpu.CompilerParams(
            dimension_semantics=("parallel",)),
    )


def renderer_forward(x, params, *, tile_m=DEFAULT_TILE_M):
    """x: (N, IN_DIM) float32.  params: list of (W_t, b), W_t: (in, out), b: (1, out)."""
    N, in_dim = x.shape
    assert in_dim == IN_DIM
    (w0, b0), (w1, b1), (w2, b2), (w3, b3) = params

    # Zero-pad the last layer to 128 output lanes -> lane-dense output stores.
    w3p = jnp.zeros((HIDDEN_DIM, OUT_PAD), w3.dtype).at[:, :OUT_DIM].set(w3)
    b3p = jnp.zeros((1, OUT_PAD), b3.dtype).at[:, :OUT_DIM].set(b3)

    # Tiny batches collapse to a single grid step; otherwise pad N up to a
    # multiple of the (large) row tile and slice the padding back off.
    tile_m = min(tile_m, _round_up(N, 8))
    tile_m = _round_up(tile_m, 8)
    n_pad = _round_up(N, tile_m)
    x_p = x if n_pad == N else jnp.pad(x, ((0, n_pad - N), (0, 0)))

    args = (x_p, w0, b0, w1, b1, w2, b2, w3p, b3p)

    try:
        out = _build_call(n_pad, tile_m, True)(*args)
        out = jax.block_until_ready(out)
    except Exception:
        # Fallback if this JAX build rejects single-buffered weight BlockSpecs.
        out = _build_call(n_pad, tile_m, False)(*args)

    return out[:N, :OUT_DIM]


def init_params(key):
    """Deterministic init matching the PyTorch layer shapes.
    nn.Linear(out, in) weight -> stored here transposed as (in, out)."""
    dims = [(IN_DIM, HIDDEN_DIM)]
    for _ in range(NUM_LAYERS - 1):
        dims.append((HIDDEN_DIM, HIDDEN_DIM))
    dims.append((HIDDEN_DIM, OUT_DIM))

    params = []
    for (fan_in, fan_out) in dims:
        key, kw, kb = jax.random.split(key, 3)
        bound = 1.0 / jnp.sqrt(fan_in)
        w_t = jax.random.uniform(kw, (fan_in, fan_out), jnp.float32, -bound, bound)
        b = jax.random.uniform(kb, (1, fan_out), jnp.float32, -bound, bound)
        params.append((w_t, b))
    return params


def reference_forward(x, params):
    h = x
    for i, (w_t, b) in enumerate(params):
        h = h @ w_t + b
        if i < len(params) - 1:
            h = jnp.maximum(h, 0.0)
    return jnp.clip(h, 0.0, 1.0)


if __name__ == "__main__":
    key = jax.random.PRNGKey(0)
    key, kx = jax.random.split(key)
    params = init_params(key)

    # Small demo batch: collapses to a single grid step.
    N = 16
    x = jax.random.normal(kx, (N, IN_DIM), jnp.float32)
    out = jax.block_until_ready(renderer_forward(x, params))
    ref = reference_forward(x, params)
    assert out.shape == (N, OUT_DIM)
    assert jnp.allclose(out, ref, atol=1e-5, rtol=1e-5)

    # Exercise the multi-step tiled/padded path (grid > 1, N not a tile multiple).
    key, kx2 = jax.random.split(key)
    N2 = 272
    x2 = jax.random.normal(kx2, (N2, IN_DIM), jnp.float32)
    out2 = jax.block_until_ready(renderer_forward(x2, params, tile_m=128))
    ref2 = reference_forward(x2, params)
    assert out2.shape == (N2, OUT_DIM)
    assert jnp.allclose(out2, ref2, atol=1e-5, rtol=1e-5)

    print("KERNEL_OK")
</pallas_src>

<mosaic_0001>
module attributes {stable_mosaic.version = 11 : i64} {
  func.func @renderer_kernel(%arg0: i32, %arg1: memref<16x64xf32, #tpu.memory_space<vmem>>, %arg2: memref<64x64xf32, #tpu.memory_space<vmem>>, %arg3: memref<1x64xf32, #tpu.memory_space<vmem>>, %arg4: memref<64x64xf32, #tpu.memory_space<vmem>>, %arg5: memref<1x64xf32, #tpu.memory_space<vmem>>, %arg6: memref<64x64xf32, #tpu.memory_space<vmem>>, %arg7: memref<1x64xf32, #tpu.memory_space<vmem>>, %arg8: memref<64x128xf32, #tpu.memory_space<vmem>>, %arg9: memref<1x128xf32, #tpu.memory_space<vmem>>, %arg10: memref<16x128xf32, #tpu.memory_space<vmem>>) attributes {dimension_semantics = [#tpu.dimension_semantics<parallel>], iteration_bounds = array<i64: 1>, scalar_prefetch = 0 : i64, scratch_operands = 0 : i64, tpu.core_type = #tpu.core_type<tc>, window_params = [{transform_indices = @transform_0, window_bounds = array<i64: 16, 64>}, {pipeline_mode = #tpu.pipeline_mode<synchronous>, transform_indices = @transform_1, window_bounds = array<i64: 64, 64>}, {pipeline_mode = #tpu.pipeline_mode<synchronous>, transform_indices = @transform_2, window_bounds = array<i64: 1, 64>}, {pipeline_mode = #tpu.pipeline_mode<synchronous>, transform_indices = @transform_3, window_bounds = array<i64: 64, 64>}, {pipeline_mode = #tpu.pipeline_mode<synchronous>, transform_indices = @transform_4, window_bounds = array<i64: 1, 64>}, {pipeline_mode = #tpu.pipeline_mode<synchronous>, transform_indices = @transform_5, window_bounds = array<i64: 64, 64>}, {pipeline_mode = #tpu.pipeline_mode<synchronous>, transform_indices = @transform_6, window_bounds = array<i64: 1, 64>}, {pipeline_mode = #tpu.pipeline_mode<synchronous>, transform_indices = @transform_7, window_bounds = array<i64: 64, 128>}, {pipeline_mode = #tpu.pipeline_mode<synchronous>, transform_indices = @transform_8, window_bounds = array<i64: 1, 128>}, {transform_indices = @transform_9, window_bounds = array<i64: 16, 128>}]} {
    %c0 = arith.constant 0 : index
    %c0_0 = arith.constant 0 : index
    %0 = vector.load %arg1[%c0, %c0_0] : memref<16x64xf32, #tpu.memory_space<vmem>>, vector<16x64xf32>
    %c0_1 = arith.constant 0 : index
    %c0_2 = arith.constant 0 : index
    %1 = vector.load %arg2[%c0_1, %c0_2] : memref<64x64xf32, #tpu.memory_space<vmem>>, vector<64x64xf32>
    %cst = arith.constant dense<0.000000e+00> : vector<16x64xf32>
    %2 = tpu.matmul %0, %1, %cst {dimension_numbers = #tpu.dot_dimension_numbers<[1], [0], [0], [1], [0, 0, 1, 1], [], []>} : vector<16x64xf32>, vector<64x64xf32>, vector<16x64xf32> -> vector<16x64xf32>
    %c0_3 = arith.constant 0 : index
    %c0_4 = arith.constant 0 : index
    %3 = vector.load %arg3[%c0_3, %c0_4] : memref<1x64xf32, #tpu.memory_space<vmem>>, vector<1x64xf32>
    %4 = vector.broadcast %3 : vector<1x64xf32> to vector<16x64xf32>
    %5 = arith.addf %2, %4 : vector<16x64xf32>
    %cst_5 = arith.constant 0.000000e+00 : f32
    %6 = vector.broadcast %cst_5 : f32 to vector<16x64xf32>
    %7 = arith.maximumf %5, %6 : vector<16x64xf32>
    %c0_6 = arith.constant 0 : index
    %c0_7 = arith.constant 0 : index
    %8 = vector.load %arg4[%c0_6, %c0_7] : memref<64x64xf32, #tpu.memory_space<vmem>>, vector<64x64xf32>
    %cst_8 = arith.constant dense<0.000000e+00> : vector<16x64xf32>
    %9 = tpu.matmul %7, %8, %cst_8 {dimension_numbers = #tpu.dot_dimension_numbers<[1], [0], [0], [1], [0, 0, 1, 1], [], []>} : vector<16x64xf32>, vector<64x64xf32>, vector<16x64xf32> -> vector<16x64xf32>
    %c0_9 = arith.constant 0 : index
    %c0_10 = arith.constant 0 : index
    %10 = vector.load %arg5[%c0_9, %c0_10] : memref<1x64xf32, #tpu.memory_space<vmem>>, vector<1x64xf32>
    %11 = vector.broadcast %10 : vector<1x64xf32> to vector<16x64xf32>
    %12 = arith.addf %9, %11 : vector<16x64xf32>
    %cst_11 = arith.constant 0.000000e+00 : f32
    %13 = vector.broadcast %cst_11 : f32 to vector<16x64xf32>
    %14 = arith.maximumf %12, %13 : vector<16x64xf32>
    %c0_12 = arith.constant 0 : index
    %c0_13 = arith.constant 0 : index
    %15 = vector.load %arg6[%c0_12, %c0_13] : memref<64x64xf32, #tpu.memory_space<vmem>>, vector<64x64xf32>
    %cst_14 = arith.constant dense<0.000000e+00> : vector<16x64xf32>
    %16 = tpu.matmul %14, %15, %cst_14 {dimension_numbers = #tpu.dot_dimension_numbers<[1], [0], [0], [1], [0, 0, 1, 1], [], []>} : vector<16x64xf32>, vector<64x64xf32>, vector<16x64xf32> -> vector<16x64xf32>
    %c0_15 = arith.constant 0 : index
    %c0_16 = arith.constant 0 : index
    %17 = vector.load %arg7[%c0_15, %c0_16] : memref<1x64xf32, #tpu.memory_space<vmem>>, vector<1x64xf32>
    %18 = vector.broadcast %17 : vector<1x64xf32> to vector<16x64xf32>
    %19 = arith.addf %16, %18 : vector<16x64xf32>
    %cst_17 = arith.constant 0.000000e+00 : f32
    %20 = vector.broadcast %cst_17 : f32 to vector<16x64xf32>
    %21 = arith.maximumf %19, %20 : vector<16x64xf32>
    %c0_18 = arith.constant 0 : index
    %c0_19 = arith.constant 0 : index
    %22 = vector.load %arg8[%c0_18, %c0_19] : memref<64x128xf32, #tpu.memory_space<vmem>>, vector<64x128xf32>
    %cst_20 = arith.constant dense<0.000000e+00> : vector<16x128xf32>
    %23 = tpu.matmul %21, %22, %cst_20 {dimension_numbers = #tpu.dot_dimension_numbers<[1], [0], [0], [1], [0, 0, 1, 1], [], []>} : vector<16x64xf32>, vector<64x128xf32>, vector<16x128xf32> -> vector<16x128xf32>
    %c0_21 = arith.constant 0 : index
    %c0_22 = arith.constant 0 : index
    %24 = vector.load %arg9[%c0_21, %c0_22] : memref<1x128xf32, #tpu.memory_space<vmem>>, vector<1x128xf32>
    %25 = vector.broadcast %24 : vector<1x128xf32> to vector<16x128xf32>
    %26 = arith.addf %23, %25 : vector<16x128xf32>
    %cst_23 = arith.constant 0.000000e+00 : f32
    %cst_24 = arith.constant 1.000000e+00 : f32
    %27 = vector.broadcast %cst_23 : f32 to vector<16x128xf32>
    %28 = arith.maximumf %27, %26 : vector<16x128xf32>
    %29 = vector.broadcast %cst_24 : f32 to vector<16x128xf32>
    %30 = arith.minimumf %29, %28 : vector<16x128xf32>
    %c0_25 = arith.constant 0 : index
    %c0_26 = arith.constant 0 : index
    %31 = vector.load %arg10[%c0_25, %c0_26] : memref<16x128xf32, #tpu.memory_space<vmem>>, vector<16x128xf32>
    tpu.vector_store %arg10[%c0_25, %c0_26], %30 {strides = array<i32>} : memref<16x128xf32, #tpu.memory_space<vmem>>, vector<16x128xf32>,
    return
  }
  func.func @transform_0(%arg0: i32) -> (i32, i32) {
    %c0_i32 = arith.constant 0 : i32
    %c0_i32_0 = arith.constant 0 : i32
    return %arg0, %c0_i32 : i32, i32
  }
  func.func @transform_1(%arg0: i32) -> (i32, i32) {
    %c0_i32 = arith.constant 0 : i32
    %c0_i32_0 = arith.constant 0 : i32
    %c0_i32_1 = arith.constant 0 : i32
    return %c0_i32, %c0_i32_0 : i32, i32
  }
  func.func @transform_2(%arg0: i32) -> (i32, i32) {
    %c0_i32 = arith.constant 0 : i32
    %c0_i32_0 = arith.constant 0 : i32
    %c0_i32_1 = arith.constant 0 : i32
    return %c0_i32, %c0_i32_0 : i32, i32
  }
  func.func @transform_3(%arg0: i32) -> (i32, i32) {
    %c0_i32 = arith.constant 0 : i32
    %c0_i32_0 = arith.constant 0 : i32
    %c0_i32_1 = arith.constant 0 : i32
    return %c0_i32, %c0_i32_0 : i32, i32
  }
  func.func @transform_4(%arg0: i32) -> (i32, i32) {
    %c0_i32 = arith.constant 0 : i32
    %c0_i32_0 = arith.constant 0 : i32
    %c0_i32_1 = arith.constant 0 : i32
    return %c0_i32, %c0_i32_0 : i32, i32
  }
  func.func @transform_5(%arg0: i32) -> (i32, i32) {
    %c0_i32 = arith.constant 0 : i32
    %c0_i32_0 = arith.constant 0 : i32
    %c0_i32_1 = arith.constant 0 : i32
    return %c0_i32, %c0_i32_0 : i32, i32
  }
  func.func @transform_6(%arg0: i32) -> (i32, i32) {
    %c0_i32 = arith.constant 0 : i32
    %c0_i32_0 = arith.constant 0 : i32
    %c0_i32_1 = arith.constant 0 : i32
    return %c0_i32, %c0_i32_0 : i32, i32
  }
  func.func @transform_7(%arg0: i32) -> (i32, i32) {
    %c0_i32 = arith.constant 0 : i32
    %c0_i32_0 = arith.constant 0 : i32
    %c0_i32_1 = arith.constant 0 : i32
    return %c0_i32, %c0_i32_0 : i32, i32
  }
  func.func @transform_8(%arg0: i32) -> (i32, i32) {
    %c0_i32 = arith.constant 0 : i32
    %c0_i32_0 = arith.constant 0 : i32
    %c0_i32_1 = arith.constant 0 : i32
    return %c0_i32, %c0_i32_0 : i32, i32
  }
  func.func @transform_9(%arg0: i32) -> (i32, i32) {
    %c0_i32 = arith.constant 0 : i32
    %c0_i32_0 = arith.constant 0 : i32
    return %arg0, %c0_i32 : i32, i32
  }
}

module attributes {stable_mosaic.version = 11 : i64} {
  func.func @renderer_kernel(%arg0: i32, %arg1: memref<16x64xf32, #tpu.memory_space<vmem>>, %arg2: memref<64x64xf32, #tpu.memory_space<vmem>>, %arg3: memref<1x64xf32, #tpu.memory_space<vmem>>, %arg4: memref<64x64xf32, #tpu.memory_space<vmem>>, %arg5: memref<1x64xf32, #tpu.memory_space<vmem>>, %arg6: memref<64x64xf32, #tpu.memory_space<vmem>>, %arg7: memref<1x64xf32, #tpu.memory_space<vmem>>, %arg8: memref<64x128xf32, #tpu.memory_space<vmem>>, %arg9: memref<1x128xf32, #tpu.memory_space<vmem>>, %arg10: memref<16x128xf32, #tpu.memory_space<vmem>>) attributes {dimension_semantics = [#tpu.dimension_semantics<parallel>], iteration_bounds = array<i64: 1>, scalar_prefetch = 0 : i64, scratch_operands = 0 : i64, tpu.core_type = #tpu.core_type<tc>, window_params = [{transform_indices = @transform_0, window_bounds = array<i64: 16, 64>}, {pipeline_mode = #tpu.pipeline_mode<synchronous>, transform_indices = @transform_1, window_bounds = array<i64: 64, 64>}, {pipeline_mode = #tpu.pipeline_mode<synchronous>, transform_indices = @transform_2, window_bounds = array<i64: 1, 64>}, {pipeline_mode = #tpu.pipeline_mode<synchronous>, transform_indices = @transform_3, window_bounds = array<i64: 64, 64>}, {pipeline_mode = #tpu.pipeline_mode<synchronous>, transform_indices = @transform_4, window_bounds = array<i64: 1, 64>}, {pipeline_mode = #tpu.pipeline_mode<synchronous>, transform_indices = @transform_5, window_bounds = array<i64: 64, 64>}, {pipeline_mode = #tpu.pipeline_mode<synchronous>, transform_indices = @transform_6, window_bounds = array<i64: 1, 64>}, {pipeline_mode = #tpu.pipeline_mode<synchronous>, transform_indices = @transform_7, window_bounds = array<i64: 64, 128>}, {pipeline_mode = #tpu.pipeline_mode<synchronous>, transform_indices = @transform_8, window_bounds = array<i64: 1, 128>}, {transform_indices = @transform_9, window_bounds = array<i64: 16, 128>}]} {
    %c0 = arith.constant 0 : index
    %c0_0 = arith.constant 0 : index
    %0 = vector.load %arg1[%c0, %c0_0] : memref<16x64xf32, #tpu.memory_space<vmem>>, vector<16x64xf32>
    %c0_1 = arith.constant 0 : index
    %c0_2 = arith.constant 0 : index
    %1 = vector.load %arg2[%c0_1, %c0_2] : memref<64x64xf32, #tpu.memory_space<vmem>>, vector<64x64xf32>
    %cst = arith.constant dense<0.000000e+00> : vector<16x64xf32>
    %2 = tpu.matmul %0, %1, %cst {dimension_numbers = #tpu.dot_dimension_numbers<[1], [0], [0], [1], [0, 0, 1, 1], [], []>} : vector<16x64xf32>, vector<64x64xf32>, vector<16x64xf32> -> vector<16x64xf32>
    %c0_3 = arith.constant 0 : index
    %c0_4 = arith.constant 0 : index
    %3 = vector.load %arg3[%c0_3, %c0_4] : memref<1x64xf32, #tpu.memory_space<vmem>>, vector<1x64xf32>
    %4 = vector.broadcast %3 : vector<1x64xf32> to vector<16x64xf32>
    %5 = arith.addf %2, %4 : vector<16x64xf32>
    %cst_5 = arith.constant 0.000000e+00 : f32
    %6 = vector.broadcast %cst_5 : f32 to vector<16x64xf32>
    %7 = arith.maximumf %5, %6 : vector<16x64xf32>
    %c0_6 = arith.constant 0 : index
    %c0_7 = arith.constant 0 : index
    %8 = vector.load %arg4[%c0_6, %c0_7] : memref<64x64xf32, #tpu.memory_space<vmem>>, vector<64x64xf32>
    %cst_8 = arith.constant dense<0.000000e+00> : vector<16x64xf32>
    %9 = tpu.matmul %7, %8, %cst_8 {dimension_numbers = #tpu.dot_dimension_numbers<[1], [0], [0], [1], [0, 0, 1, 1], [], []>} : vector<16x64xf32>, vector<64x64xf32>, vector<16x64xf32> -> vector<16x64xf32>
    %c0_9 = arith.constant 0 : index
    %c0_10 = arith.constant 0 : index
    %10 = vector.load %arg5[%c0_9, %c0_10] : memref<1x64xf32, #tpu.memory_space<vmem>>, vector<1x64xf32>
    %11 = vector.broadcast %10 : vector<1x64xf32> to vector<16x64xf32>
    %12 = arith.addf %9, %11 : vector<16x64xf32>
    %cst_11 = arith.constant 0.000000e+00 : f32
    %13 = vector.broadcast %cst_11 : f32 to vector<16x64xf32>
    %14 = arith.maximumf %12, %13 : vector<16x64xf32>
    %c0_12 = arith.constant 0 : index
    %c0_13 = arith.constant 0 : index
    %15 = vector.load %arg6[%c0_12, %c0_13] : memref<64x64xf32, #tpu.memory_space<vmem>>, vector<64x64xf32>
    %cst_14 = arith.constant dense<0.000000e+00> : vector<16x64xf32>
    %16 = tpu.matmul %14, %15, %cst_14 {dimension_numbers = #tpu.dot_dimension_numbers<[1], [0], [0], [1], [0, 0, 1, 1], [], []>} : vector<16x64xf32>, vector<64x64xf32>, vector<16x64xf32> -> vector<16x64xf32>
    %c0_15 = arith.constant 0 : index
    %c0_16 = arith.constant 0 : index
    %17 = vector.load %arg7[%c0_15, %c0_16] : memref<1x64xf32, #tpu.memory_space<vmem>>, vector<1x64xf32>
    %18 = vector.broadcast %17 : vector<1x64xf32> to vector<16x64xf32>
    %19 = arith.addf %16, %18 : vector<16x64xf32>
    %cst_17 = arith.constant 0.000000e+00 : f32
    %20 = vector.broadcast %cst_17 : f32 to vector<16x64xf32>
    %21 = arith.maximumf %19, %20 : vector<16x64xf32>
    %c0_18 = arith.constant 0 : index
    %c0_19 = arith.constant 0 : index
    %22 = vector.load %arg8[%c0_18, %c0_19] : memref<64x128xf32, #tpu.memory_space<vmem>>, vector<64x128xf32>
    %cst_20 = arith.constant dense<0.000000e+00> : vector<16x128xf32>
    %23 = tpu.matmul %21, %22, %cst_20 {dimension_numbers = #tpu.dot_dimension_numbers<[1], [0], [0], [1], [0, 0, 1, 1], [], []>} : vector<16x64xf32>, vector<64x128xf32>, vector<16x128xf32> -> vector<16x128xf32>
    %c0_21 = arith.constant 0 : index
    %c0_22 = arith.constant 0 : index
    %24 = vector.load %arg9[%c0_21, %c0_22] : memref<1x128xf32, #tpu.memory_space<vmem>>, vector<1x128xf32>
    %25 = vector.broadcast %24 : vector<1x128xf32> to vector<16x128xf32>
    %26 = arith.addf %23, %25 : vector<16x128xf32>
    %cst_23 = arith.constant 0.000000e+00 : f32
    %cst_24 = arith.constant 1.000000e+00 : f32
    %27 = vector.broadcast %cst_23 : f32 to vector<16x128xf32>
    %28 = arith.maximumf %27, %26 : vector<16x128xf32>
    %29 = vector.broadcast %cst_24 : f32 to vector<16x128xf32>
    %30 = arith.minimumf %29, %28 : vector<16x128xf32>
    %c0_25 = arith.constant 0 : index
    %c0_26 = arith.constant 0 : index
    %31 = vector.load %arg10[%c0_25, %c0_26] : memref<16x128xf32, #tpu.memory_space<vmem>>, vector<16x128xf32>
    tpu.vector_store %arg10[%c0_25, %c0_26], %30 {strides = array<i32>} : memref<16x128xf32, #tpu.memory_space<vmem>>, vector<16x128xf32>,
    return
  }
  func.func @transform_0(%arg0: i32) -> (i32, i32) {
    %c0_i32 = arith.constant 0 : i32
    %c0_i32_0 = arith.constant 0 : i32
    return %arg0, %c0_i32 : i32, i32
  }
  func.func @transform_1(%arg0: i32) -> (i32, i32) {
    %c0_i32 = arith.constant 0 : i32
    %c0_i32_0 = arith.constant 0 : i32
    %c0_i32_1 = arith.constant 0 : i32
    return %c0_i32, %c0_i32_0 : i32, i32
  }
  func.func @transform_2(%arg0: i32) -> (i32, i32) {
    %c0_i32 = arith.constant 0 : i32
    %c0_i32_0 = arith.constant 0 : i32
    %c0_i32_1 = arith.constant 0 : i32
    return %c0_i32, %c0_i32_0 : i32, i32
  }
  func.func @transform_3(%arg0: i32) -> (i32, i32) {
    %c0_i32 = arith.constant 0 : i32
    %c0_i32_0 = arith.constant 0 : i32
    %c0_i32_1 = arith.constant 0 : i32
    return %c0_i32, %c0_i32_0 : i32, i32
  }
  func.func @transform_4(%arg0: i32) -> (i32, i32) {
    %c0_i32 = arith.constant 0 : i32
    %c0_i32_0 = arith.constant 0 : i32
    %c0_i32_1 = arith.constant 0 : i32
    return %c0_i32, %c0_i32_0 : i32, i32
  }
  func.func @transform_5(%arg0: i32) -> (i32, i32) {
    %c0_i32 = arith.constant 0 : i32
    %c0_i32_0 = arith.constant 0 : i32
    %c0_i32_1 = arith.constant 0 : i32
    return %c0_i32, %c0_i32_0 : i32, i32
  }
  func.func @transform_6(%arg0: i32) -> (i32, i32) {
    %c0_i32 = arith.constant 0 : i32
    %c0_i32_0 = arith.constant 0 : i32
    %c0_i32_1 = arith.constant 0 : i32
    return %c0_i32, %c0_i32_0 : i32, i32
  }
  func.func @transform_7(%arg0: i32) -> (i32, i32) {
    %c0_i32 = arith.constant 0 : i32
    %c0_i32_0 = arith.constant 0 : i32
    %c0_i32_1 = arith.constant 0 : i32
    return %c0_i32, %c0_i32_0 : i32, i32
  }
  func.func @transform_8(%arg0: i32) -> (i32, i32) {
    %c0_i32 = arith.constant 0 : i32
    %c0_i32_0 = arith.constant 0 : i32
    %c0_i32_1 = arith.constant 0 : i32
    return %c0_i32, %c0_i32_0 : i32, i32
  }
  func.func @transform_9(%arg0: i32) -> (i32, i32) {
    %c0_i32 = arith.constant 0 : i32
    %c0_i32_0 = arith.constant 0 : i32
    return %arg0, %c0_i32 : i32, i32
  }
}

</mosaic_0001>

<bundles_post_ra>
// kernel: tpu_custom_call.1
= control target key start
LH: loop header
LB: loop body
LE: loop exit
PB: predicated region body
PF: predicated region fallthrough
CT: control target
= control target key end

     0   :  { %14 = vsyncpa [#allocation3], 0  ;;  %s1041_s0 = inlined_call_operand.hbm [shape: f32[16,64], index: 0, kind: input, shape index: {}]   ;;  %s1042_s1 = inlined_call_operand.hbm [shape: f32[64,64], index: 1, kind: input, shape index: {}]   ;;  %s1043_s2 = inlined_call_operand.vmem [shape: f32[1,64], index: 2, kind: input, shape index: {}]   ;;  %s1044_s3 = inlined_call_operand.hbm [shape: f32[64,64], index: 3, kind: input, shape index: {}]   ;;  %s1045_s4 = inlined_call_operand.vmem [shape: f32[1,64], index: 4, kind: input, shape index: {}]   ;;  %s1046_s5 = inlined_call_operand.hbm [shape: f32[64,64], index: 5, kind: input, shape index: {}]   ;;  %s1047_s6 = inlined_call_operand.vmem [shape: f32[1,64], index: 6, kind: input, shape index: {}]   ;;  %s1048_s7 = inlined_call_operand.hbm [shape: f32[64,128], index: 7, kind: input, shape index: {}]   ;;  %s1049_s8 = inlined_call_operand.vmem [shape: f32[1,128], index: 8, kind: input, shape index: {}]   ;;  %s1050_s9 = inlined_call_operand.hbm [shape: f32[16,128], index: 9, kind: output, shape index: {}]  }
   0x1   :  { %15 = vsyncpa [#allocation6], 0 }
   0x2   :  { %16 = vsyncpa [#allocation9], 0 }
   0x3   :  { %17 = vsyncpa [#allocation4], 0  ;;  %s859_s30 = smov [#allocation5]   ;;  %s860_s11 = smov [#allocation8]  }
   0x4   :  { %s35_s10 = sshll.u32 %s859_s30, 4  ;;  %s63_s12 = sshll.u32 %s860_s11, 4  ;;  %s36_s10 = int_to_ptr.vmem [resolvable:$true] %s35_s10  ;;  %s917_s12 = int_to_ptr.vmem [resolvable:$true] %s63_s12 }
   0x5   :  { %s719_s15 = scalar_lea.hbm %s1042_s1, 1024 }
   0x6   :  { %p720_p0 = scmp.ne.s32.totalorder %s1042_s1, %s719_s15  ;;  %p723_p1 = scmp.lt.u32.totalorder %s719_s15, %s1042_s1 }
   0x8   :  { %p725_p2 = pnand %p723_p1, %p720_p0 }
   0xa   :  { %728 = shalt.err (!%p725_p2)
}
   0xb   :  { %s729_s20 = scalar_lea.vmem %s36_s10, 1024  ;;  %p734_p4 = scmp.lt.s32.totalorder %s36_s10, %s36_s10 }
   0xc   :  { %p730_p3 = scmp.ne.s32.totalorder %s36_s10, %s729_s20  ;;  %p735_p5 = scmp.lt.s32.totalorder %s729_s20, %s729_s20 }
   0xe   :  { %p736_p6 = por %p735_p5, %p734_p4 }
  0x10   :  { %p737_p7 = pnand %p736_p6, %p730_p3 }
  0x12   :  { %740 = shalt.err (!%p737_p7)
}
  0x13   :  { %s861_s21 = smov 128   ;;  %s862_s22 = smov 8  }
  0x14   :  { %41 = dma.hbm_to_vmem [thread:$0]  %s1042_s1, 1024, %s36_s10, [#allocation6], %s861_s21, %s861_s21, %s862_s22  }
  0x15   :  { %s741_s27 = scalar_lea.hbm %s1046_s5, 1024 }
  0x16   :  { %p742_p8 = scmp.ne.s32.totalorder %s1046_s5, %s741_s27  ;;  %p745_p9 = scmp.lt.u32.totalorder %s741_s27, %s1046_s5 }
  0x18   :  { %p747_p10 = pnand %p745_p9, %p742_p8 }
  0x1a   :  { %750 = shalt.err (!%p747_p10)
}
  0x1b   :  { %s751_s13 = scalar_lea.vmem %s917_s12, 1024  ;;  %p756_p12 = scmp.lt.s32.totalorder %s917_s12, %s917_s12 }
  0x1c   :  { %p752_p11 = scmp.ne.s32.totalorder %s917_s12, %s751_s13  ;;  %p757_p13 = scmp.lt.s32.totalorder %s751_s13, %s751_s13 }
  0x1e   :  { %p758_p0 = por %p757_p13, %p756_p12 }
  0x20   :  { %p759_p1 = pnand %p758_p0, %p752_p11 }
  0x22   :  { %762 = shalt.err (!%p759_p1)
}
  0x23   :  { %69 = dma.hbm_to_vmem [thread:$0]  %s1046_s5, 1024, %s917_s12, [#allocation9], %s861_s21, %s861_s21, %s862_s22  }
  0x24   :  { %s863_s14 = smov [#allocation2]   ;;  %s864_s16 = smov [#allocation7]  }
  0x25   :  { %s23_s15 = sshll.u32 %s863_s14, 4  ;;  %s49_s17 = sshll.u32 %s864_s16, 4  ;;  %s24_s15 = int_to_ptr.vmem [resolvable:$true] %s23_s15  ;;  %s954_s17 = int_to_ptr.vmem [resolvable:$true] %s49_s17 }
  0x26   :  { %s763_s20 = scalar_lea.hbm %s1041_s0, 256 }
  0x27   :  { %p764_p2 = scmp.ne.s32.totalorder %s1041_s0, %s763_s20  ;;  %p767_p3 = scmp.lt.u32.totalorder %s763_s20, %s1041_s0 }
  0x29   :  { %p769_p4 = pnand %p767_p3, %p764_p2 }
  0x2b   :  { %772 = shalt.err (!%p769_p4)
}
  0x2c   :  { %s773_s5 = scalar_lea.vmem %s24_s15, 256  ;;  %p778_p6 = scmp.lt.s32.totalorder %s24_s15, %s24_s15 }
  0x2d   :  { %p774_p5 = scmp.ne.s32.totalorder %s24_s15, %s773_s5  ;;  %p779_p7 = scmp.lt.s32.totalorder %s773_s5, %s773_s5 }
  0x2f   :  { %p780_p8 = por %p779_p7, %p778_p6 }
  0x31   :  { %p781_p9 = pnand %p780_p8, %p774_p5 }
  0x33   :  { %784 = shalt.err (!%p781_p9)
}
  0x34   :  { %29 = dma.hbm_to_vmem [thread:$0]  %s1041_s0, 256, %s24_s15, [#allocation3], %s861_s21, %s861_s21, %s862_s22  }
  0x35   :  { %s785_s30 = scalar_lea.hbm %s1044_s3, 1024 }
  0x36   :  { %p786_p10 = scmp.ne.s32.totalorder %s1044_s3, %s785_s30  ;;  %p789_p11 = scmp.lt.u32.totalorder %s785_s30, %s1044_s3 }
  0x38   :  { %p791_p12 = pnand %p789_p11, %p786_p10 }
  0x3a   :  { %794 = shalt.err (!%p791_p12)
}
  0x3b   :  { %s795_s14 = scalar_lea.vmem %s954_s17, 1024  ;;  %p800_p0 = scmp.lt.s32.totalorder %s954_s17, %s954_s17 }
  0x3c   :  { %p796_p13 = scmp.ne.s32.totalorder %s954_s17, %s795_s14  ;;  %p801_p1 = scmp.lt.s32.totalorder %s795_s14, %s795_s14 }
  0x3e   :  { %p802_p2 = por %p801_p1, %p800_p0 }
  0x40   :  { %p803_p3 = pnand %p802_p2, %p796_p13 }
  0x42   :  { %806 = shalt.err (!%p803_p3)
}
  0x43   :  { %55 = dma.hbm_to_vmem [thread:$0]  %s1044_s3, 1024, %s954_s17, [#allocation6], %s861_s21, %s861_s21, %s862_s22  }
  0x44   :  { %s865_s16 = smov [#allocation10]   ;;  %s807_s23 = scalar_lea.hbm %s1048_s7, 1024 }
  0x45   :  { %s77_s18 = sshll.u32 %s865_s16, 4  ;;  %p808_p4 = scmp.ne.s32.totalorder %s1048_s7, %s807_s23  ;;  %s78_s18 = int_to_ptr.vmem [resolvable:$true] %s77_s18 }
  0x46   :  { %p811_p5 = scmp.lt.u32.totalorder %s807_s23, %s1048_s7 }
  0x48   :  { %p813_p6 = pnand %p811_p5, %p808_p4 }
  0x4a   :  { %816 = shalt.err (!%p813_p6)
}
  0x4b   :  { %s817_s12 = scalar_lea.vmem %s78_s18, 1024  ;;  %p822_p8 = scmp.lt.s32.totalorder %s78_s18, %s78_s18 }
  0x4c   :  { %p818_p7 = scmp.ne.s32.totalorder %s78_s18, %s817_s12  ;;  %p823_p9 = scmp.lt.s32.totalorder %s817_s12, %s817_s12 }
  0x4e   :  { %p824_p10 = por %p823_p9, %p822_p8 }
  0x50   :  { %p825_p11 = pnand %p824_p10, %p818_p7 }
  0x52   :  { %828 = shalt.err (!%p825_p11)
}
  0x53   :  { %83 = dma.hbm_to_vmem [thread:$0]  %s1048_s7, 1024, %s78_s18, [#allocation9], %s861_s21, %s861_s21, %s862_s22  }
  0x54   :  { %851 = dma.done.wait [#allocation3], 256  }
  0x55   :  { %852 = vsyncadd [#allocation3], 4294967040 }
  0x56   :  { %853 = dma.done.wait [#allocation6], 2048  }
  0x57   :  { %854 = vsyncadd [#allocation6], 4294965248 }
  0x58   :  { %855 = dma.done.wait [#allocation9], 2048  }
  0x59   :  { %856 = vsyncadd [#allocation9], 4294965248  ;;  %v103_v0 = vld [vmem:[#allocation5] sm:$0xff]  ;;  %v104_v1 = vld [vmem:[#allocation5 + $0x8] sm:$0xff]  ;;  %vm118_vm0 = vcmask 523264  }
  0x5a   :  { %v105_v2 = vld [vmem:[#allocation5 + $0x10] sm:$0xff]  ;;  %v647_v3 = vpack.c.bf16 %v104_v1, %v103_v0  ;;  %v106_v4 = vld [vmem:[#allocation5 + $0x18] sm:$0xff]  ;;  %v107_v6 = vld [vmem:[#allocation5 + $0x20] sm:$0xff] }
  0x5b   :  { %v651_v5 = vpack.c.bf16 %v106_v4, %v105_v2  ;;  %v108_v7 = vld [vmem:[#allocation5 + $0x28] sm:$0xff]  ;;  %v101_v8 = vld [vmem:[#allocation2] sm:$0xff]  ;;  %v202_v9 = vld [vmem:[#allocation7] sm:$0xff] }
  0x5c   :  { %648 = vmatprep.subr.bf16.mxu0 %v647_v3  ;;  %587 = vmatprep.mubr.msk.f32.mxu0 %vm118_vm0, %v101_v8  ;;  %v203_v10 = vld [vmem:[#allocation7 + $0x8] sm:$0xff]  ;;  %v204_v12 = vld [vmem:[#allocation7 + $0x10] sm:$0xff]  ;;  %v205_v13 = vld [vmem:[#allocation7 + $0x18] sm:$0xff]  ;;  %v655_v14 = vpack.c.bf16 %v108_v7, %v107_v6 }
  0x5d   :  { %650 = vmatpush3.bf16.msra.mxu0 %v647_v3  ;;  %v663_v11 = vpack.c.bf16 %v203_v10, %v202_v9  ;;  %v667_v15 = vpack.c.bf16 %v205_v13, %v204_v12  ;;  %v206_v16 = vld [vmem:[#allocation7 + $0x20] sm:$0xff]  ;;  %v207_v17 = vld [vmem:[#allocation7 + $0x28] sm:$0xff]  ;;  %v109_v18 = vld [vmem:[#allocation5 + $0x30] sm:$0xff] }
  0x5e   :  { %652 = vmatprep.subr.bf16.mxu0 %v651_v5  ;;  %v110_v19 = vld [vmem:[#allocation5 + $0x38] sm:$0xff]  ;;  %v671_v20 = vpack.c.bf16 %v207_v17, %v206_v16  ;;  %v208_v23 = vld [vmem:[#allocation7 + $0x30] sm:$0xff]  ;;  %v300_v26 = vld [vmem:[#allocation8] sm:$0xff] }
  0x5f   :  { %664 = vmatprep.subr.bf16.mxu1 %v663_v11  ;;  %v659_v21 = vpack.c.bf16 %v110_v19, %v109_v18  ;;  %v102_v22 = vld [vmem:[#allocation2 + $0x8] sm:$0xff]  ;;  %v301_v27 = vld [vmem:[#allocation8 + $0x8] sm:$0xff]  ;;  %v302_v28 = vld [vmem:[#allocation8 + $0x10] sm:$0xff] }
  0x60   :  { %666 = vmatpush3.bf16.msra.mxu1 %v663_v11  ;;  %v209_v24 = vld [vmem:[#allocation7 + $0x38] sm:$0xff]  ;;  %v679_v29 = vpack.c.bf16 %v301_v27, %v300_v26  ;;  %v304_v32 = vld [vmem:[#allocation8 + $0x20] sm:$0xff]  ;;  %v305_v33 = vld [vmem:[#allocation8 + $0x28] sm:$0xff] }
  0x61   :  { %654 = vmatpush3.bf16.msra.mxu0 %v651_v5  ;;  %668 = vmatprep.subr.bf16.mxu1 %v667_v15  ;;  %v675_v25 = vpack.c.bf16 %v209_v24, %v208_v23  ;;  %v303_v30 = vld [vmem:[#allocation8 + $0x18] sm:$0xff]  ;;  %v687_v34 = vpack.c.bf16 %v305_v33, %v304_v32  ;;  %v519_v35 = vld [vmem:[%s1043_s2] ss:$0 sm:$0xff]  ;;  %v398_v45 = vld [vmem:[#allocation10] sm:$0xff] }
  0x62   :  { %656 = vmatprep.subr.bf16.mxu0 %v655_v14  ;;  %v683_v31 = vpack.c.bf16 %v303_v30, %v302_v28  ;;  %v306_v42 = vld [vmem:[#allocation8 + $0x30] sm:$0xff]  ;;  %v307_v43 = vld [vmem:[#allocation8 + $0x38] sm:$0xff]  ;;  %v399_v46 = vld [vmem:[#allocation10 + $0x8] sm:$0xff] }
  0x63   :  { %v691_v44 = vpack.c.bf16 %v307_v43, %v306_v42  ;;  %v400_v47 = vld [vmem:[#allocation10 + $0x10] sm:$0xff]  ;;  %v695_v48 = vpack.c.bf16 %v399_v46, %v398_v45  ;;  %v401_v49 = vld [vmem:[#allocation10 + $0x18] sm:$0xff]  ;;  %v402_v51 = vld [vmem:[#allocation10 + $0x20] sm:$0xff] }
  0x64   :  { %670 = vmatpush3.bf16.msra.mxu1 %v667_v15  ;;  %v699_v50 = vpack.c.bf16 %v401_v49, %v400_v47  ;;  %v403_v52 = vld [vmem:[#allocation10 + $0x28] sm:$0xff]  ;;  %v522_v54 = vld [vmem:[%s1045_s4] ss:$0 sm:$0xff]  ;;  %v405_v62 = vld [vmem:[#allocation10 + $0x38] sm:$0xff] }
  0x65   :  { %658 = vmatpush3.bf16.msra.mxu0 %v655_v14  ;;  %672 = vmatprep.subr.bf16.mxu1 %v671_v20  ;;  %v703_v53 = vpack.c.bf16 %v403_v52, %v402_v51  ;;  %v404_v61 = vld [vmem:[#allocation10 + $0x30] sm:$0xff] }
  0x66   :  { %660 = vmatprep.subr.bf16.mxu0 %v659_v21  ;;  %v707_v63 = vpack.c.bf16 %v405_v62, %v404_v61  ;;  %v525_v0 = vld [vmem:[%s1047_s6] ss:$0 sm:$0xff]  ;;  %s866_s6 = smov [#allocation11]  }
  0x67   :  { %v528_v7 = vld [vmem:[%s1049_s8] ss:$0 sm:$0xff]  ;;  %s505_s13 = sshll.u32 %s866_s6, 4  ;;  %s506_s13 = int_to_ptr.vmem [resolvable:$true] %s505_s13 }
  0x68   :  { %674 = vmatpush3.bf16.msra.mxu1 %v671_v20  ;;  %s829_s1 = scalar_lea.vmem %s506_s13, 256  ;;  %p834_p13 = scmp.lt.s32.totalorder %s506_s13, %s506_s13 }
  0x69   :  { %662 = vmatpush3.bf16.msra.mxu0 %v659_v21  ;;  %676 = vmatprep.subr.bf16.mxu1 %v675_v25  ;;  %p830_p12 = scmp.ne.s32.totalorder %s506_s13, %s829_s1  ;;  %p835_p0 = scmp.lt.s32.totalorder %s829_s1, %s829_s1 }
  0x6a   :  { %680 = vmatprep.subr.bf16.mxu0 %v679_v29 }
  0x6b   :  { %p836_p1 = por %p835_p0, %p834_p13 }
  0x6c   :  { %588 = vmatmul.mubr.msk.f32.vlgmr.msra.gmra.mrb[0].mxu0 %vm118_vm0, %v102_v22  ;;  %678 = vmatpush3.bf16.msra.mxu1 %v675_v25 }
  0x6d   :  { %682 = vmatpush3.bf16.msra.mxu0 %v679_v29  ;;  %696 = vmatprep.subr.bf16.mxu1 %v695_v48  ;;  %p837_p2 = pnand %p836_p1, %p830_p12 }
  0x6e   :  { %684 = vmatprep.subr.bf16.mxu0 %v683_v31 }
  0x71   :  { %686 = vmatpush3.bf16.msra.mxu0 %v683_v31 }
  0x72   :  { %688 = vmatprep.subr.bf16.mxu0 %v687_v34 }
  0x75   :  { %690 = vmatpush3.bf16.msra.mxu0 %v687_v34 }
  0x76   :  { %692 = vmatprep.subr.bf16.mxu0 %v691_v44 }
  0x79   :  { %694 = vmatpush3.bf16.msra.mxu0 %v691_v44 }
 0x13f   :  { %v589_v36 = vpop.f32.mrb[0].mxu0 }
 0x140   :  { %v197_v37 = vadd.f32 %v589_v36, %v519_v35  ;;  %v191_v38 = vpop.f32.mrb[1].mxu0 }
 0x141   :  { %v192_v39 = vadd.f32 %v519_v35, %v191_v38 }
 0x142   :  { %v201_v41 = vmax.f32 %v197_v37, 0.0 }
 0x143   :  { %v200_v40 = vmax.f32 %v192_v39, 0.0 }
 0x145   :  { %606 = vmatprep.mubr.msk.f32.mxu1 %vm118_vm0, %v200_v40 }
 0x146   :  { %607 = vmatmul.mubr.msk.f32.vlgmr.msra.gmra.mrb[0].mxu1 %vm118_vm0, %v201_v41 }
 0x147   :  { %698 = vmatpush3.bf16.msra.mxu1 %v695_v48 }
 0x148   :  { %700 = vmatprep.subr.bf16.mxu1 %v699_v50 }
 0x14b   :  { %702 = vmatpush3.bf16.msra.mxu1 %v699_v50 }
 0x14c   :  { %704 = vmatprep.subr.bf16.mxu1 %v703_v53 }
 0x14f   :  { %706 = vmatpush3.bf16.msra.mxu1 %v703_v53 }
 0x150   :  { %708 = vmatprep.subr.bf16.mxu1 %v707_v63 }
 0x153   :  { %710 = vmatpush3.bf16.msra.mxu1 %v707_v63 }
 0x219   :  { %v608_v55 = vpop.f32.mrb[0].mxu1 }
 0x21a   :  { %v295_v56 = vadd.f32 %v608_v55, %v522_v54  ;;  %v289_v57 = vpop.f32.mrb[1].mxu1 }
 0x21b   :  { %v290_v58 = vadd.f32 %v522_v54, %v289_v57 }
 0x21c   :  { %v299_v60 = vmax.f32 %v295_v56, 0.0 }
 0x21d   :  { %v298_v59 = vmax.f32 %v290_v58, 0.0 }
 0x21f   :  { %625 = vmatprep.mubr.msk.f32.mxu0 %vm118_vm0, %v298_v59 }
 0x220   :  { %626 = vmatmul.mubr.msk.f32.vlgmr.msra.gmra.mrb[2].mxu0 %vm118_vm0, %v299_v60 }
 0x2f3   :  { %v627_v1 = vpop.f32.mrb[2].mxu0 }
 0x2f4   :  { %v393_v2 = vadd.f32 %v627_v1, %v525_v0  ;;  %v387_v3 = vpop.f32.mrb[3].mxu0 }
 0x2f5   :  { %v388_v4 = vadd.f32 %v525_v0, %v387_v3 }
 0x2f6   :  { %v397_v6 = vmax.f32 %v393_v2, 0.0 }
 0x2f7   :  { %v396_v5 = vmax.f32 %v388_v4, 0.0 }
 0x2f9   :  { %644 = vmatprep.mubr.msk.f32.mxu1 %vm118_vm0, %v396_v5 }
 0x2fa   :  { %645 = vmatmul.mubr.msk.f32.vlgmr.msra.gmra.mrb[2].mxu1 %vm118_vm0, %v397_v6 }
 0x3cd   :  { %v646_v8 = vpop.f32.mrb[2].mxu1 }
 0x3ce   :  { %v491_v9 = vadd.f32 %v646_v8, %v528_v7  ;;  %v485_v10 = vpop.f32.mrb[3].mxu1 }
 0x3cf   :  { %v486_v11 = vadd.f32 %v528_v7, %v485_v10 }
 0x3d0   :  { %v495_v12 = vmax.f32 %v491_v9, 0.0 }
 0x3d1   :  { %v494_v13 = vmax.f32 %v486_v11, 0.0 }
 0x3d2   :  { %v497_v14 = vmin.f32 %v495_v12, 1.0 }
 0x3d3   :  { %v496_v15 = vmin.f32 %v494_v13, 1.0 }
 0x3d4   :  { %499 = vst [vmem:[#allocation11 + $0x8] sm:$0xff] %v497_v14 }
 0x3d5   :  { %498 = vst [vmem:[#allocation11] sm:$0xff] %v496_v15 }
 0x3d6   :  { %840 = shalt.err (!%p837_p2)
}
 0x3d7   :  { %s841_s14 = scalar_lea.hbm %s1050_s9, 256 }
 0x3d8   :  { %p842_p3 = scmp.ne.s32.totalorder %s1050_s9, %s841_s14  ;;  %p845_p4 = scmp.lt.u32.totalorder %s841_s14, %s1050_s9 }
 0x3da   :  { %p847_p5 = pnand %p845_p4, %p842_p3 }
 0x3dc   :  { %850 = shalt.err (!%p847_p5)
}
 0x3dd   :  { %511 = dma.vmem_to_hbm [thread:$0]  %s506_s13, 256, %s1050_s9, [#allocation4], %s861_s21, %s861_s21, %s862_s22  }
 0x3de   :  { %857 = dma.done.wait [#allocation4], 256  }
 0x3df   :  { %858 = vsyncadd [#allocation4], 4294967040 }
 0x3e0   :  { %515 = vsyncpa [#allocation3], 1 }
 0x3e1   :  { %516 = vsyncpa [#allocation6], 1 }
 0x3e2   :  { %517 = vsyncpa [#allocation9], 1 }
 0x3e3   :  { %518 = vsyncpa [#allocation4], 1 }

// kernel: tpu_custom_call.1
= control target key start
LH: loop header
LB: loop body
LE: loop exit
PB: predicated region body
PF: predicated region fallthrough
CT: control target
= control target key end

     0   :  { %14 = vsyncpa [#allocation3], 0  ;;  %s1041_s0 = inlined_call_operand.hbm [shape: f32[16,64], index: 0, kind: input, shape index: {}]   ;;  %s1042_s1 = inlined_call_operand.hbm [shape: f32[64,64], index: 1, kind: input, shape index: {}]   ;;  %s1043_s2 = inlined_call_operand.vmem [shape: f32[1,64], index: 2, kind: input, shape index: {}]   ;;  %s1044_s3 = inlined_call_operand.hbm [shape: f32[64,64], index: 3, kind: input, shape index: {}]   ;;  %s1045_s4 = inlined_call_operand.vmem [shape: f32[1,64], index: 4, kind: input, shape index: {}]   ;;  %s1046_s5 = inlined_call_operand.hbm [shape: f32[64,64], index: 5, kind: input, shape index: {}]   ;;  %s1047_s6 = inlined_call_operand.vmem [shape: f32[1,64], index: 6, kind: input, shape index: {}]   ;;  %s1048_s7 = inlined_call_operand.hbm [shape: f32[64,128], index: 7, kind: input, shape index: {}]   ;;  %s1049_s8 = inlined_call_operand.vmem [shape: f32[1,128], index: 8, kind: input, shape index: {}]   ;;  %s1050_s9 = inlined_call_operand.hbm [shape: f32[16,128], index: 9, kind: output, shape index: {}]  }
   0x1   :  { %15 = vsyncpa [#allocation6], 0 }
   0x2   :  { %16 = vsyncpa [#allocation9], 0 }
   0x3   :  { %17 = vsyncpa [#allocation4], 0  ;;  %s859_s30 = smov [#allocation5]   ;;  %s860_s11 = smov [#allocation8]  }
   0x4   :  { %s35_s10 = sshll.u32 %s859_s30, 4  ;;  %s63_s12 = sshll.u32 %s860_s11, 4  ;;  %s36_s10 = int_to_ptr.vmem [resolvable:$true] %s35_s10  ;;  %s917_s12 = int_to_ptr.vmem [resolvable:$true] %s63_s12 }
   0x5   :  { %s719_s15 = scalar_lea.hbm %s1042_s1, 1024 }
   0x6   :  { %p720_p0 = scmp.ne.s32.totalorder %s1042_s1, %s719_s15  ;;  %p723_p1 = scmp.lt.u32.totalorder %s719_s15, %s1042_s1 }
   0x8   :  { %p725_p2 = pnand %p723_p1, %p720_p0 }
   0xa   :  { %728 = shalt.err (!%p725_p2)
}
   0xb   :  { %s729_s20 = scalar_lea.vmem %s36_s10, 1024  ;;  %p734_p4 = scmp.lt.s32.totalorder %s36_s10, %s36_s10 }
   0xc   :  { %p730_p3 = scmp.ne.s32.totalorder %s36_s10, %s729_s20  ;;  %p735_p5 = scmp.lt.s32.totalorder %s729_s20, %s729_s20 }
   0xe   :  { %p736_p6 = por %p735_p5, %p734_p4 }
  0x10   :  { %p737_p7 = pnand %p736_p6, %p730_p3 }
  0x12   :  { %740 = shalt.err (!%p737_p7)
}
  0x13   :  { %s861_s21 = smov 128   ;;  %s862_s22 = smov 8  }
  0x14   :  { %41 = dma.hbm_to_vmem [thread:$0]  %s1042_s1, 1024, %s36_s10, [#allocation6], %s861_s21, %s861_s21, %s862_s22  }
  0x15   :  { %s741_s27 = scalar_lea.hbm %s1046_s5, 1024 }
  0x16   :  { %p742_p8 = scmp.ne.s32.totalorder %s1046_s5, %s741_s27  ;;  %p745_p9 = scmp.lt.u32.totalorder %s741_s27, %s1046_s5 }
  0x18   :  { %p747_p10 = pnand %p745_p9, %p742_p8 }
  0x1a   :  { %750 = shalt.err (!%p747_p10)
}
  0x1b   :  { %s751_s13 = scalar_lea.vmem %s917_s12, 1024  ;;  %p756_p12 = scmp.lt.s32.totalorder %s917_s12, %s917_s12 }
  0x1c   :  { %p752_p11 = scmp.ne.s32.totalorder %s917_s12, %s751_s13  ;;  %p757_p13 = scmp.lt.s32.totalorder %s751_s13, %s751_s13 }
  0x1e   :  { %p758_p0 = por %p757_p13, %p756_p12 }
  0x20   :  { %p759_p1 = pnand %p758_p0, %p752_p11 }
  0x22   :  { %762 = shalt.err (!%p759_p1)
}
  0x23   :  { %69 = dma.hbm_to_vmem [thread:$0]  %s1046_s5, 1024, %s917_s12, [#allocation9], %s861_s21, %s861_s21, %s862_s22  }
  0x24   :  { %s863_s14 = smov [#allocation2]   ;;  %s864_s16 = smov [#allocation7]  }
  0x25   :  { %s23_s15 = sshll.u32 %s863_s14, 4  ;;  %s49_s17 = sshll.u32 %s864_s16, 4  ;;  %s24_s15 = int_to_ptr.vmem [resolvable:$true] %s23_s15  ;;  %s954_s17 = int_to_ptr.vmem [resolvable:$true] %s49_s17 }
  0x26   :  { %s763_s20 = scalar_lea.hbm %s1041_s0, 256 }
  0x27   :  { %p764_p2 = scmp.ne.s32.totalorder %s1041_s0, %s763_s20  ;;  %p767_p3 = scmp.lt.u32.totalorder %s763_s20, %s1041_s0 }
  0x29   :  { %p769_p4 = pnand %p767_p3, %p764_p2 }
  0x2b   :  { %772 = shalt.err (!%p769_p4)
}
  0x2c   :  { %s773_s5 = scalar_lea.vmem %s24_s15, 256  ;;  %p778_p6 = scmp.lt.s32.totalorder %s24_s15, %s24_s15 }
  0x2d   :  { %p774_p5 = scmp.ne.s32.totalorder %s24_s15, %s773_s5  ;;  %p779_p7 = scmp.lt.s32.totalorder %s773_s5, %s773_s5 }
  0x2f   :  { %p780_p8 = por %p779_p7, %p778_p6 }
  0x31   :  { %p781_p9 = pnand %p780_p8, %p774_p5 }
  0x33   :  { %784 = shalt.err (!%p781_p9)
}
  0x34   :  { %29 = dma.hbm_to_vmem [thread:$0]  %s1041_s0, 256, %s24_s15, [#allocation3], %s861_s21, %s861_s21, %s862_s22  }
  0x35   :  { %s785_s30 = scalar_lea.hbm %s1044_s3, 1024 }
  0x36   :  { %p786_p10 = scmp.ne.s32.totalorder %s1044_s3, %s785_s30  ;;  %p789_p11 = scmp.lt.u32.totalorder %s785_s30, %s1044_s3 }
  0x38   :  { %p791_p12 = pnand %p789_p11, %p786_p10 }
  0x3a   :  { %794 = shalt.err (!%p791_p12)
}
  0x3b   :  { %s795_s14 = scalar_lea.vmem %s954_s17, 1024  ;;  %p800_p0 = scmp.lt.s32.totalorder %s954_s17, %s954_s17 }
  0x3c   :  { %p796_p13 = scmp.ne.s32.totalorder %s954_s17, %s795_s14  ;;  %p801_p1 = scmp.lt.s32.totalorder %s795_s14, %s795_s14 }
  0x3e   :  { %p802_p2 = por %p801_p1, %p800_p0 }
  0x40   :  { %p803_p3 = pnand %p802_p2, %p796_p13 }
  0x42   :  { %806 = shalt.err (!%p803_p3)
}
  0x43   :  { %55 = dma.hbm_to_vmem [thread:$0]  %s1044_s3, 1024, %s954_s17, [#allocation6], %s861_s21, %s861_s21, %s862_s22  }
  0x44   :  { %s865_s16 = smov [#allocation10]   ;;  %s807_s23 = scalar_lea.hbm %s1048_s7, 1024 }
  0x45   :  { %s77_s18 = sshll.u32 %s865_s16, 4  ;;  %p808_p4 = scmp.ne.s32.totalorder %s1048_s7, %s807_s23  ;;  %s78_s18 = int_to_ptr.vmem [resolvable:$true] %s77_s18 }
  0x46   :  { %p811_p5 = scmp.lt.u32.totalorder %s807_s23, %s1048_s7 }
  0x48   :  { %p813_p6 = pnand %p811_p5, %p808_p4 }
  0x4a   :  { %816 = shalt.err (!%p813_p6)
}
  0x4b   :  { %s817_s12 = scalar_lea.vmem %s78_s18, 1024  ;;  %p822_p8 = scmp.lt.s32.totalorder %s78_s18, %s78_s18 }
  0x4c   :  { %p818_p7 = scmp.ne.s32.totalorder %s78_s18, %s817_s12  ;;  %p823_p9 = scmp.lt.s32.totalorder %s817_s12, %s817_s12 }
  0x4e   :  { %p824_p10 = por %p823_p9, %p822_p8 }
  0x50   :  { %p825_p11 = pnand %p824_p10, %p818_p7 }
  0x52   :  { %828 = shalt.err (!%p825_p11)
}
  0x53   :  { %83 = dma.hbm_to_vmem [thread:$0]  %s1048_s7, 1024, %s78_s18, [#allocation9], %s861_s21, %s861_s21, %s862_s22  }
  0x54   :  { %851 = dma.done.wait [#allocation3], 256  }
  0x55   :  { %852 = vsyncadd [#allocation3], 4294967040 }
  0x56   :  { %853 = dma.done.wait [#allocation6], 2048  }
  0x57   :  { %854 = vsyncadd [#allocation6], 4294965248 }
  0x58   :  { %855 = dma.done.wait [#allocation9], 2048  }
  0x59   :  { %856 = vsyncadd [#allocation9], 4294965248  ;;  %v103_v0 = vld [vmem:[#allocation5] sm:$0xff]  ;;  %v104_v1 = vld [vmem:[#allocation5 + $0x8] sm:$0xff]  ;;  %vm118_vm0 = vcmask 523264  }
  0x5a   :  { %v105_v2 = vld [vmem:[#allocation5 + $0x10] sm:$0xff]  ;;  %v647_v3 = vpack.c.bf16 %v104_v1, %v103_v0  ;;  %v106_v4 = vld [vmem:[#allocation5 + $0x18] sm:$0xff]  ;;  %v107_v6 = vld [vmem:[#allocation5 + $0x20] sm:$0xff] }
  0x5b   :  { %v651_v5 = vpack.c.bf16 %v106_v4, %v105_v2  ;;  %v108_v7 = vld [vmem:[#allocation5 + $0x28] sm:$0xff]  ;;  %v101_v8 = vld [vmem:[#allocation2] sm:$0xff]  ;;  %v202_v9 = vld [vmem:[#allocation7] sm:$0xff] }
  0x5c   :  { %648 = vmatprep.subr.bf16.mxu0 %v647_v3  ;;  %587 = vmatprep.mubr.msk.f32.mxu0 %vm118_vm0, %v101_v8  ;;  %v203_v10 = vld [vmem:[#allocation7 + $0x8] sm:$0xff]  ;;  %v204_v12 = vld [vmem:[#allocation7 + $0x10] sm:$0xff]  ;;  %v205_v13 = vld [vmem:[#allocation7 + $0x18] sm:$0xff]  ;;  %v655_v14 = vpack.c.bf16 %v108_v7, %v107_v6 }
  0x5d   :  { %650 = vmatpush3.bf16.msra.mxu0 %v647_v3  ;;  %v663_v11 = vpack.c.bf16 %v203_v10, %v202_v9  ;;  %v667_v15 = vpack.c.bf16 %v205_v13, %v204_v12  ;;  %v206_v16 = vld [vmem:[#allocation7 + $0x20] sm:$0xff]  ;;  %v207_v17 = vld [vmem:[#allocation7 + $0x28] sm:$0xff]  ;;  %v109_v18 = vld [vmem:[#allocation5 + $0x30] sm:$0xff] }
  0x5e   :  { %652 = vmatprep.subr.bf16.mxu0 %v651_v5  ;;  %v110_v19 = vld [vmem:[#allocation5 + $0x38] sm:$0xff]  ;;  %v671_v20 = vpack.c.bf16 %v207_v17, %v206_v16  ;;  %v208_v23 = vld [vmem:[#allocation7 + $0x30] sm:$0xff]  ;;  %v300_v26 = vld [vmem:[#allocation8] sm:$0xff] }
  0x5f   :  { %664 = vmatprep.subr.bf16.mxu1 %v663_v11  ;;  %v659_v21 = vpack.c.bf16 %v110_v19, %v109_v18  ;;  %v102_v22 = vld [vmem:[#allocation2 + $0x8] sm:$0xff]  ;;  %v301_v27 = vld [vmem:[#allocation8 + $0x8] sm:$0xff]  ;;  %v302_v28 = vld [vmem:[#allocation8 + $0x10] sm:$0xff] }
  0x60   :  { %666 = vmatpush3.bf16.msra.mxu1 %v663_v11  ;;  %v209_v24 = vld [vmem:[#allocation7 + $0x38] sm:$0xff]  ;;  %v679_v29 = vpack.c.bf16 %v301_v27, %v300_v26  ;;  %v304_v32 = vld [vmem:[#allocation8 + $0x20] sm:$0xff]  ;;  %v305_v33 = vld [vmem:[#allocation8 + $0x28] sm:$0xff] }
  0x61   :  { %654 = vmatpush3.bf16.msra.mxu0 %v651_v5  ;;  %668 = vmatprep.subr.bf16.mxu1 %v667_v15  ;;  %v675_v25 = vpack.c.bf16 %v209_v24, %v208_v23  ;;  %v303_v30 = vld [vmem:[#allocation8 + $0x18] sm:$0xff]  ;;  %v687_v34 = vpack.c.bf16 %v305_v33, %v304_v32  ;;  %v519_v35 = vld [vmem:[%s1043_s2] ss:$0 sm:$0xff]  ;;  %v398_v45 = vld [vmem:[#allocation10] sm:$0xff] }
  0x62   :  { %656 = vmatprep.subr.bf16.mxu0 %v655_v14  ;;  %v683_v31 = vpack.c.bf16 %v303_v30, %v302_v28  ;;  %v306_v42 = vld [vmem:[#allocation8 + $0x30] sm:$0xff]  ;;  %v307_v43 = vld [vmem:[#allocation8 + $0x38] sm:$0xff]  ;;  %v399_v46 = vld [vmem:[#allocation10 + $0x8] sm:$0xff] }
  0x63   :  { %v691_v44 = vpack.c.bf16 %v307_v43, %v306_v42  ;;  %v400_v47 = vld [vmem:[#allocation10 + $0x10] sm:$0xff]  ;;  %v695_v48 = vpack.c.bf16 %v399_v46, %v398_v45  ;;  %v401_v49 = vld [vmem:[#allocation10 + $0x18] sm:$0xff]  ;;  %v402_v51 = vld [vmem:[#allocation10 + $0x20] sm:$0xff] }
  0x64   :  { %670 = vmatpush3.bf16.msra.mxu1 %v667_v15  ;;  %v699_v50 = vpack.c.bf16 %v401_v49, %v400_v47  ;;  %v403_v52 = vld [vmem:[#allocation10 + $0x28] sm:$0xff]  ;;  %v522_v54 = vld [vmem:[%s1045_s4] ss:$0 sm:$0xff]  ;;  %v405_v62 = vld [vmem:[#allocation10 + $0x38] sm:$0xff] }
  0x65   :  { %658 = vmatpush3.bf16.msra.mxu0 %v655_v14  ;;  %672 = vmatprep.subr.bf16.mxu1 %v671_v20  ;;  %v703_v53 = vpack.c.bf16 %v403_v52, %v402_v51  ;;  %v404_v61 = vld [vmem:[#allocation10 + $0x30] sm:$0xff] }
  0x66   :  { %660 = vmatprep.subr.bf16.mxu0 %v659_v21  ;;  %v707_v63 = vpack.c.bf16 %v405_v62, %v404_v61  ;;  %v525_v0 = vld [vmem:[%s1047_s6] ss:$0 sm:$0xff]  ;;  %s866_s6 = smov [#allocation11]  }
  0x67   :  { %v528_v7 = vld [vmem:[%s1049_s8] ss:$0 sm:$0xff]  ;;  %s505_s13 = sshll.u32 %s866_s6, 4  ;;  %s506_s13 = int_to_ptr.vmem [resolvable:$true] %s505_s13 }
  0x68   :  { %674 = vmatpush3.bf16.msra.mxu1 %v671_v20  ;;  %s829_s1 = scalar_lea.vmem %s506_s13, 256  ;;  %p834_p13 = scmp.lt.s32.totalorder %s506_s13, %s506_s13 }
  0x69   :  { %662 = vmatpush3.bf16.msra.mxu0 %v659_v21  ;;  %676 = vmatprep.subr.bf16.mxu1 %v675_v25  ;;  %p830_p12 = scmp.ne.s32.totalorder %s506_s13, %s829_s1  ;;  %p835_p0 = scmp.lt.s32.totalorder %s829_s1, %s829_s1 }
  0x6a   :  { %680 = vmatprep.subr.bf16.mxu0 %v679_v29 }
  0x6b   :  { %p836_p1 = por %p835_p0, %p834_p13 }
  0x6c   :  { %588 = vmatmul.mubr.msk.f32.vlgmr.msra.gmra.mrb[0].mxu0 %vm118_vm0, %v102_v22  ;;  %678 = vmatpush3.bf16.msra.mxu1 %v675_v25 }
  0x6d   :  { %682 = vmatpush3.bf16.msra.mxu0 %v679_v29  ;;  %696 = vmatprep.subr.bf16.mxu1 %v695_v48  ;;  %p837_p2 = pnand %p836_p1, %p830_p12 }
  0x6e   :  { %684 = vmatprep.subr.bf16.mxu0 %v683_v31 }
  0x71   :  { %686 = vmatpush3.bf16.msra.mxu0 %v683_v31 }
  0x72   :  { %688 = vmatprep.subr.bf16.mxu0 %v687_v34 }
  0x75   :  { %690 = vmatpush3.bf16.msra.mxu0 %v687_v34 }
  0x76   :  { %692 = vmatprep.subr.bf16.mxu0 %v691_v44 }
  0x79   :  { %694 = vmatpush3.bf16.msra.mxu0 %v691_v44 }
 0x13f   :  { %v589_v36 = vpop.f32.mrb[0].mxu0 }
 0x140   :  { %v197_v37 = vadd.f32 %v589_v36, %v519_v35  ;;  %v191_v38 = vpop.f32.mrb[1].mxu0 }
 0x141   :  { %v192_v39 = vadd.f32 %v519_v35, %v191_v38 }
 0x142   :  { %v201_v41 = vmax.f32 %v197_v37, 0.0 }
 0x143   :  { %v200_v40 = vmax.f32 %v192_v39, 0.0 }
 0x145   :  { %606 = vmatprep.mubr.msk.f32.mxu1 %vm118_vm0, %v200_v40 }
 0x146   :  { %607 = vmatmul.mubr.msk.f32.vlgmr.msra.gmra.mrb[0].mxu1 %vm118_vm0, %v201_v41 }
 0x147   :  { %698 = vmatpush3.bf16.msra.mxu1 %v695_v48 }
 0x148   :  { %700 = vmatprep.subr.bf16.mxu1 %v699_v50 }
 0x14b   :  { %702 = vmatpush3.bf16.msra.mxu1 %v699_v50 }
 0x14c   :  { %704 = vmatprep.subr.bf16.mxu1 %v703_v53 }
 0x14f   :  { %706 = vmatpush3.bf16.msra.mxu1 %v703_v53 }
 0x150   :  { %708 = vmatprep.subr.bf16.mxu1 %v707_v63 }
 0x153   :  { %710 = vmatpush3.bf16.msra.mxu1 %v707_v63 }
 0x219   :  { %v608_v55 = vpop.f32.mrb[0].mxu1 }
 0x21a   :  { %v295_v56 = vadd.f32 %v608_v55, %v522_v54  ;;  %v289_v57 = vpop.f32.mrb[1].mxu1 }
 0x21b   :  { %v290_v58 = vadd.f32 %v522_v54, %v289_v57 }
 0x21c   :  { %v299_v60 = vmax.f32 %v295_v56, 0.0 }
 0x21d   :  { %v298_v59 = vmax.f32 %v290_v58, 0.0 }
 0x21f   :  { %625 = vmatprep.mubr.msk.f32.mxu0 %vm118_vm0, %v298_v59 }
 0x220   :  { %626 = vmatmul.mubr.msk.f32.vlgmr.msra.gmra.mrb[2].mxu0 %vm118_vm0, %v299_v60 }
 0x2f3   :  { %v627_v1 = vpop.f32.mrb[2].mxu0 }
 0x2f4   :  { %v393_v2 = vadd.f32 %v627_v1, %v525_v0  ;;  %v387_v3 = vpop.f32.mrb[3].mxu0 }
 0x2f5   :  { %v388_v4 = vadd.f32 %v525_v0, %v387_v3 }
 0x2f6   :  { %v397_v6 = vmax.f32 %v393_v2, 0.0 }
 0x2f7   :  { %v396_v5 = vmax.f32 %v388_v4, 0.0 }
 0x2f9   :  { %644 = vmatprep.mubr.msk.f32.mxu1 %vm118_vm0, %v396_v5 }
 0x2fa   :  { %645 = vmatmul.mubr.msk.f32.vlgmr.msra.gmra.mrb[2].mxu1 %vm118_vm0, %v397_v6 }
 0x3cd   :  { %v646_v8 = vpop.f32.mrb[2].mxu1 }
 0x3ce   :  { %v491_v9 = vadd.f32 %v646_v8, %v528_v7  ;;  %v485_v10 = vpop.f32.mrb[3].mxu1 }
 0x3cf   :  { %v486_v11 = vadd.f32 %v528_v7, %v485_v10 }
 0x3d0   :  { %v495_v12 = vmax.f32 %v491_v9, 0.0 }
 0x3d1   :  { %v494_v13 = vmax.f32 %v486_v11, 0.0 }
 0x3d2   :  { %v497_v14 = vmin.f32 %v495_v12, 1.0 }
 0x3d3   :  { %v496_v15 = vmin.f32 %v494_v13, 1.0 }
 0x3d4   :  { %499 = vst [vmem:[#allocation11 + $0x8] sm:$0xff] %v497_v14 }
 0x3d5   :  { %498 = vst [vmem:[#allocation11] sm:$0xff] %v496_v15 }
 0x3d6   :  { %840 = shalt.err (!%p837_p2)
}
 0x3d7   :  { %s841_s14 = scalar_lea.hbm %s1050_s9, 256 }
 0x3d8   :  { %p842_p3 = scmp.ne.s32.totalorder %s1050_s9, %s841_s14  ;;  %p845_p4 = scmp.lt.u32.totalorder %s841_s14, %s1050_s9 }
 0x3da   :  { %p847_p5 = pnand %p845_p4, %p842_p3 }
 0x3dc   :  { %850 = shalt.err (!%p847_p5)
}
 0x3dd   :  { %511 = dma.vmem_to_hbm [thread:$0]  %s506_s13, 256, %s1050_s9, [#allocation4], %s861_s21, %s861_s21, %s862_s22  }
 0x3de   :  { %857 = dma.done.wait [#allocation4], 256  }
 0x3df   :  { %858 = vsyncadd [#allocation4], 4294967040 }
 0x3e0   :  { %515 = vsyncpa [#allocation3], 1 }
 0x3e1   :  { %516 = vsyncpa [#allocation6], 1 }
 0x3e2   :  { %517 = vsyncpa [#allocation9], 1 }
 0x3e3   :  { %518 = vsyncpa [#allocation4], 1 }

</bundles_post_ra>
